<compile_context>
chip_gen: v7x
topology: tpu7x:2x2x1
jax: 0.10.0
libtpu: 0.0.40
codegen_flags: <defaults>
</compile_context>

<pallas_src>
import functools
import math

import jax
import jax.numpy as jnp
from jax import lax
from jax.experimental import pallas as pl
from jax.experimental.pallas import tpu as pltpu


# ----------------------------------------------------------------------------
# Tiling helpers
# ----------------------------------------------------------------------------
def _round_up(x: int, m: int) -> int:
    return (x + m - 1) // m * m


def _pick_m_tile(M: int):
    if M >= 256:
        Mp = _round_up(M, 256)
        return Mp, 256
    Mp = _round_up(M, 8)
    return Mp, Mp


def _pick_n_tile(N: int):
    if N >= 256:
        Np = _round_up(N, 256)
        return Np, 256
    Np = _round_up(N, 128)
    return Np, Np


def _pick_k_tile(K: int):
    Kr = _round_up(K, 128)
    if Kr <= 1024:
        return Kr, Kr
    for t in (512, 256, 128):
        if Kr % t == 0:
            return Kr, t
    return Kr, 128  # unreachable (Kr is a multiple of 128)


# ----------------------------------------------------------------------------
# Fused  matmul * scale + bias (+ residual) (+ relu)  kernel  (Conv+BN+ReLU)
# ----------------------------------------------------------------------------
def _mm_bn_act_kernel(x_ref, w_ref, s_ref, b_ref, o_ref, acc_ref, *, relu):
    @pl.when(pl.program_id(2) == 0)
    def _init():
        acc_ref[...] = jnp.zeros_like(acc_ref)

    acc_ref[...] += jnp.dot(x_ref[...], w_ref[...],
                            preferred_element_type=jnp.float32)

    @pl.when(pl.program_id(2) == pl.num_programs(2) - 1)
    def _finalize():
        out = acc_ref[...] * s_ref[...] + b_ref[...]
        if relu:
            out = jnp.maximum(out, 0.0)
        o_ref[...] = out.astype(o_ref.dtype)


def _mm_bn_res_act_kernel(x_ref, w_ref, s_ref, b_ref, r_ref, o_ref, acc_ref, *,
                          relu):
    @pl.when(pl.program_id(2) == 0)
    def _init():
        acc_ref[...] = jnp.zeros_like(acc_ref)

    acc_ref[...] += jnp.dot(x_ref[...], w_ref[...],
                            preferred_element_type=jnp.float32)

    @pl.when(pl.program_id(2) == pl.num_programs(2) - 1)
    def _finalize():
        out = acc_ref[...] * s_ref[...] + b_ref[...] + r_ref[...].astype(jnp.float32)
        if relu:
            out = jnp.maximum(out, 0.0)
        o_ref[...] = out.astype(o_ref.dtype)


def fused_matmul_bn(x, w, scale, bias, *, residual=None, relu=True,
                    out_dtype=jnp.float32):
    """relu?( (x @ w) * scale + bias (+ residual) ), fully inside one Pallas kernel."""
    M, K = x.shape
    Kw, N = w.shape
    assert K == Kw
    Mp, TM = _pick_m_tile(M)
    Np, TN = _pick_n_tile(N)
    Kp, TK = _pick_k_tile(K)

    xp = jnp.pad(x, ((0, Mp - M), (0, Kp - K)))
    wp = jnp.pad(w, ((0, Kp - K), (0, Np - N)))
    sp = jnp.pad(scale.reshape(1, N).astype(jnp.float32), ((0, 0), (0, Np - N)))
    bp = jnp.pad(bias.reshape(1, N).astype(jnp.float32), ((0, 0), (0, Np - N)))

    grid = (Mp // TM, Np // TN, Kp // TK)
    x_spec = pl.BlockSpec((TM, TK), lambda i, j, k: (i, k))
    w_spec = pl.BlockSpec((TK, TN), lambda i, j, k: (k, j))
    s_spec = pl.BlockSpec((1, TN), lambda i, j, k: (0, j))
    b_spec = pl.BlockSpec((1, TN), lambda i, j, k: (0, j))
    o_spec = pl.BlockSpec((TM, TN), lambda i, j, k: (i, j))

    cparams = pltpu.CompilerParams(
        dimension_semantics=("parallel", "parallel", "arbitrary"))
    scratch = [pltpu.VMEM((TM, TN), jnp.float32)]
    out_shape = jax.ShapeDtypeStruct((Mp, Np), out_dtype)

    if residual is None:
        out = pl.pallas_call(
            functools.partial(_mm_bn_act_kernel, relu=relu),
            out_shape=out_shape,
            grid_spec=pltpu.PrefetchScalarGridSpec(
                num_scalar_prefetch=0, grid=grid,
                in_specs=[x_spec, w_spec, s_spec, b_spec],
                out_specs=o_spec, scratch_shapes=scratch),
            compiler_params=cparams,
        )(xp, wp, sp, bp)
    else:
        r_spec = pl.BlockSpec((TM, TN), lambda i, j, k: (i, j))
        rp = jnp.pad(residual.astype(jnp.float32), ((0, Mp - M), (0, Np - N)))
        out = pl.pallas_call(
            functools.partial(_mm_bn_res_act_kernel, relu=relu),
            out_shape=out_shape,
            grid_spec=pltpu.PrefetchScalarGridSpec(
                num_scalar_prefetch=0, grid=grid,
                in_specs=[x_spec, w_spec, s_spec, b_spec, r_spec],
                out_specs=o_spec, scratch_shapes=scratch),
            compiler_params=cparams,
        )(xp, wp, sp, bp, rp)
    return out[:M, :N]


# ----------------------------------------------------------------------------
# Conv2d (+BN+ReLU) = im2col (XLA slicing) + fused Pallas matmul
# ----------------------------------------------------------------------------
def conv_bn(x, w, scale, bias, *, stride, padding, relu, residual=None):
    """x: (N,H,W,Cin) NHWC.  w: (kh,kw,Cin,Cout).  Returns (N,OH,OW,Cout)."""
    N, H, W, C = x.shape
    kh, kw, cin, cout = w.shape
    assert cin == C
    OH = (H + 2 * padding - kh) // stride + 1
    OW = (W + 2 * padding - kw) // stride + 1

    if kh == 1 and kw == 1 and padding == 0:
        xs = x[:, ::stride, ::stride, :]
        patches = xs.reshape(N * OH * OW, C)
    else:
        xp = jnp.pad(x, ((0, 0), (padding, padding), (padding, padding), (0, 0)))
        taps = []
        for dy in range(kh):
            for dx in range(kw):
                taps.append(xp[:, dy:dy + stride * (OH - 1) + 1:stride,
                               dx:dx + stride * (OW - 1) + 1:stride, :])
        patches = jnp.concatenate(taps, axis=-1).reshape(N * OH * OW, kh * kw * C)

    wmat = w.reshape(kh * kw * C, cout)
    res_flat = None
    if residual is not None:
        assert residual.shape == (N, OH, OW, cout)
        res_flat = residual.reshape(N * OH * OW, cout)

    out = fused_matmul_bn(patches, wmat, scale, bias,
                          residual=res_flat, relu=relu)
    return out.reshape(N, OH, OW, cout)


# ----------------------------------------------------------------------------
# MaxPool2d(kernel_size=3, stride=2, padding=0, ceil_mode=True)
# ----------------------------------------------------------------------------
def _maxpool_kernel(x_ref, o_ref):
    m = x_ref[0]
    for t in range(1, 9):
        m = jnp.maximum(m, x_ref[t])
    o_ref[...] = m


def maxpool_3x3_s2_ceil(x):
    """x: NHWC.  Matches PyTorch MaxPool2d(3, 2, padding=0, ceil_mode=True)."""
    N, H, W, C = x.shape
    OH = -(-(H - 3) // 2) + 1
    OW = -(-(W - 3) // 2) + 1
    Hp = 2 * (OH - 1) + 3
    Wp = 2 * (OW - 1) + 3
    xp = jnp.pad(x, ((0, 0), (0, Hp - H), (0, Wp - W), (0, 0)),
                 constant_values=-jnp.inf)
    taps = [xp[:, dy:dy + 2 * (OH - 1) + 1:2, dx:dx + 2 * (OW - 1) + 1:2, :]
            for dy in range(3) for dx in range(3)]
    taps = jnp.stack(taps, axis=0).reshape(9, N * OH * OW, C)

    M = N * OH * OW
    Mp = _round_up(M, 8)
    if Mp <= 512:
        TM = Mp
    else:
        TM = 8
        for t in (512, 256, 128, 64, 32, 16, 8):
            if Mp % t == 0:
                TM = t
                break
    if Mp != M:
        taps = jnp.pad(taps, ((0, 0), (0, Mp - M), (0, 0)))

    out = pl.pallas_call(
        _maxpool_kernel,
        out_shape=jax.ShapeDtypeStruct((Mp, C), x.dtype),
        grid_spec=pltpu.PrefetchScalarGridSpec(
            num_scalar_prefetch=0,
            grid=(Mp // TM,),
            in_specs=[pl.BlockSpec((9, TM, C), lambda i: (0, i, 0))],
            out_specs=pl.BlockSpec((TM, C), lambda i: (i, 0))),
        compiler_params=pltpu.CompilerParams(dimension_semantics=("parallel",)),
    )(taps)
    return out[:M].reshape(N, OH, OW, C)


# ----------------------------------------------------------------------------
# AvgPool2d(7, stride=1) on a 7x7 map == global average pool
# ----------------------------------------------------------------------------
def _global_avgpool_kernel(x_ref, o_ref, *, inv_count):
    s = jnp.sum(x_ref[...].astype(jnp.float32), axis=1, keepdims=True)
    o_ref[...] = (s * inv_count).astype(o_ref.dtype)


def avgpool_7x7(x):
    N, H, W, C = x.shape
    assert H == 7 and W == 7, "AvgPool2d(7, stride=1) expects a 7x7 feature map"
    xr = x.reshape(N, H * W, C)
    out = pl.pallas_call(
        functools.partial(_global_avgpool_kernel, inv_count=1.0 / (H * W)),
        out_shape=jax.ShapeDtypeStruct((N, 1, C), x.dtype),
        grid_spec=pltpu.PrefetchScalarGridSpec(
            num_scalar_prefetch=0,
            grid=(N,),
            in_specs=[pl.BlockSpec((1, H * W, C), lambda n: (n, 0, 0))],
            out_specs=pl.BlockSpec((1, 1, C), lambda n: (n, 0, 0))),
        compiler_params=pltpu.CompilerParams(dimension_semantics=("parallel",)),
    )(xr)
    return out.reshape(N, C)


# ----------------------------------------------------------------------------
# ResNet (Bottleneck) parameters + forward
# ----------------------------------------------------------------------------
_BN_EPS = 1e-5
_EXPANSION = 4


def _conv_params(key, kh, kw, cin, cout):
    n = kh * kw * cout
    std = math.sqrt(2.0 / n)
    w = std * jax.random.normal(key, (kh, kw, cin, cout), dtype=jnp.float32)
    # Eval-mode BN with the module's init: gamma=1, beta=0, mean=0, var=1.
    scale = jnp.full((cout,), 1.0 / math.sqrt(1.0 + _BN_EPS), dtype=jnp.float32)
    bias = jnp.zeros((cout,), dtype=jnp.float32)
    return {"w": w, "scale": scale, "bias": bias}


def init_resnet_params(key, layers=(3, 4, 6, 3)):
    params = {}
    key, k = jax.random.split(key)
    params["stem"] = _conv_params(k, 7, 7, 3, 64)
    inplanes = 64
    stages = []
    for stage_idx, (planes, blocks) in enumerate(zip((64, 128, 256, 512), layers)):
        stage_stride = 1 if stage_idx == 0 else 2
        blocks_params = []
        for b in range(blocks):
            s = stage_stride if b == 0 else 1
            key, k1, k2, k3, k4 = jax.random.split(key, 5)
            blk = {
                "conv1": _conv_params(k1, 1, 1, inplanes, planes),
                "conv2": _conv_params(k2, 3, 3, planes, planes),
                "conv3": _conv_params(k3, 1, 1, planes, planes * _EXPANSION),
            }
            if b == 0 and (s != 1 or inplanes != planes * _EXPANSION):
                blk["downsample"] = _conv_params(k4, 1, 1, inplanes,
                                                 planes * _EXPANSION)
            blocks_params.append(blk)
            inplanes = planes * _EXPANSION
        stages.append(blocks_params)
    params["stages"] = stages
    return params


def bottleneck(x, blk, *, stride):
    p1, p2, p3 = blk["conv1"], blk["conv2"], blk["conv3"]
    out = conv_bn(x, p1["w"], p1["scale"], p1["bias"],
                  stride=stride, padding=0, relu=True)
    out = conv_bn(out, p2["w"], p2["scale"], p2["bias"],
                  stride=1, padding=1, relu=True)
    if "downsample" in blk:
        pd = blk["downsample"]
        residual = conv_bn(x, pd["w"], pd["scale"], pd["bias"],
                           stride=stride, padding=0, relu=False)
    else:
        residual = x
    # conv3 + bn3 + residual add + relu fused into one kernel epilogue.
    out = conv_bn(out, p3["w"], p3["scale"], p3["bias"],
                  stride=1, padding=0, relu=True, residual=residual)
    return out


def resnet_forward(params, x_nchw):
    x = jnp.transpose(x_nchw, (0, 2, 3, 1))  # NCHW -> NHWC (lane-dense channels)
    p = params["stem"]
    x = conv_bn(x, p["w"], p["scale"], p["bias"], stride=2, padding=3, relu=True)
    x = maxpool_3x3_s2_ceil(x)
    for stage_idx, blocks in enumerate(params["stages"]):
        stage_stride = 1 if stage_idx == 0 else 2
        for b_idx, blk in enumerate(blocks):
            s = stage_stride if b_idx == 0 else 1
            x = bottleneck(x, blk, stride=s)
    x = avgpool_7x7(x)          # (N, 2048)  == avgpool + flatten in the reference
    return x


# ----------------------------------------------------------------------------
# Self checks + demo
# ----------------------------------------------------------------------------
def _selfcheck_fused_matmul():
    key = jax.random.PRNGKey(42)
    kx, kw, ks, kb, kr = jax.random.split(key, 5)
    M, K, N = 96, 176, 200
    q = lambda k, s: jnp.round(jax.random.normal(k, s, dtype=jnp.float32) * 4.0) / 4.0
    x, w = q(kx, (M, K)), q(kw, (K, N))
    scale, bias, res = q(ks, (N,)), q(kb, (N,)), q(kr, (M, N))

    got = fused_matmul_bn(x, w, scale, bias, residual=res, relu=True)
    want = jnp.maximum(x @ w * scale[None, :] + bias[None, :] + res, 0.0)
    assert jnp.allclose(got, want, atol=2e-2, rtol=2e-2), float(
        jnp.max(jnp.abs(got - want)))

    got2 = fused_matmul_bn(x, w, scale, bias, relu=False)
    want2 = x @ w * scale[None, :] + bias[None, :]
    assert jnp.allclose(got2, want2, atol=2e-2, rtol=2e-2), float(
        jnp.max(jnp.abs(got2 - want2)))


def _selfcheck_maxpool():
    x = jax.random.normal(jax.random.PRNGKey(7), (1, 12, 12, 64), dtype=jnp.float32)
    got = maxpool_3x3_s2_ceil(x)
    # Independent reference (ceil_mode via explicit trailing -inf padding).
    N, H, W, C = x.shape
    OH = -(-(H - 3) // 2) + 1
    OW = -(-(W - 3) // 2) + 1
    ph, pw = 2 * (OH - 1) + 3 - H, 2 * (OW - 1) + 3 - W
    want = lax.reduce_window(x, -jnp.inf, lax.max, (1, 3, 3, 1), (1, 2, 2, 1),
                             ((0, 0), (0, ph), (0, pw), (0, 0)))
    assert got.shape == want.shape
    assert jnp.allclose(got, want), float(jnp.max(jnp.abs(got - want)))


if __name__ == "__main__":
    _selfcheck_fused_matmul()
    _selfcheck_maxpool()

    # Small Bottleneck-ResNet config for the demo (the class supports any
    # `layers`; [3,4,6,3] == ResNet-50).  Spatial 224 is required by the
    # reference's AvgPool2d(7) after five stride-2 stages.
    LAYERS = (1, 1, 1, 1)
    key = jax.random.PRNGKey(0)
    kp, kx = jax.random.split(key)
    params = init_resnet_params(kp, layers=LAYERS)
    x = jax.random.normal(kx, (2, 3, 224, 224), dtype=jnp.float32)

    forward = jax.jit(resnet_forward)
    feats = forward(params, x)
    feats = jax.block_until_ready(feats)

    assert feats.shape == (2, 512 * _EXPANSION), feats.shape
    assert bool(jnp.all(jnp.isfinite(feats))), "non-finite values in output"
    print("KERNEL_OK")
</pallas_src>

<mosaic_0001>
module attributes {stable_mosaic.version = 11 : i64} {
  func.func @_mm_bn_res_act_kernel(%arg0: i32, %arg1: i32, %arg2: i32, %arg3: memref<96x256xf32, #tpu.memory_space<vmem>>, %arg4: memref<256x256xf32, #tpu.memory_space<vmem>>, %arg5: memref<1x256xf32, #tpu.memory_space<vmem>>, %arg6: memref<1x256xf32, #tpu.memory_space<vmem>>, %arg7: memref<96x256xf32, #tpu.memory_space<vmem>>, %arg8: memref<96x256xf32, #tpu.memory_space<vmem>>, %arg9: memref<96x256xf32, #tpu.memory_space<vmem>>) attributes {dimension_semantics = [#tpu.dimension_semantics<parallel>, #tpu.dimension_semantics<parallel>, #tpu.dimension_semantics<arbitrary>], iteration_bounds = array<i64: 1, 1, 1>, scalar_prefetch = 0 : i64, scratch_operands = 1 : i64, tpu.core_type = #tpu.core_type<tc>, window_params = [{transform_indices = @transform_0, window_bounds = array<i64: 96, 256>}, {transform_indices = @transform_1, window_bounds = array<i64: 256, 256>}, {transform_indices = @transform_2, window_bounds = array<i64: 1, 256>}, {transform_indices = @transform_3, window_bounds = array<i64: 1, 256>}, {transform_indices = @transform_4, window_bounds = array<i64: 96, 256>}, {transform_indices = @transform_5, window_bounds = array<i64: 96, 256>}]} {
    %c0_i32 = arith.constant 0 : i32
    %0 = arith.cmpi eq, %arg2, %c0_i32 : i32
    %1 = arith.extui %0 : i1 to i32
    %c0_i32_0 = arith.constant 0 : i32
    %2 = arith.cmpi ne, %1, %c0_i32_0 : i32
    scf.if %2 {
      %cst_10 = arith.constant 0.000000e+00 : f32
      %12 = vector.broadcast %cst_10 : f32 to vector<96x256xf32>
      %c0_11 = arith.constant 0 : index
      %c0_12 = arith.constant 0 : index
      %13 = vector.load %arg9[%c0_11, %c0_12] : memref<96x256xf32, #tpu.memory_space<vmem>>, vector<96x256xf32>
      tpu.vector_store %arg9[%c0_11, %c0_12], %12 {strides = array<i32>} : memref<96x256xf32, #tpu.memory_space<vmem>>, vector<96x256xf32>,
    } else {
    }
    %c0 = arith.constant 0 : index
    %c0_1 = arith.constant 0 : index
    %3 = vector.load %arg9[%c0, %c0_1] : memref<96x256xf32, #tpu.memory_space<vmem>>, vector<96x256xf32>
    %c0_2 = arith.constant 0 : index
    %c0_3 = arith.constant 0 : index
    %4 = vector.load %arg3[%c0_2, %c0_3] : memref<96x256xf32, #tpu.memory_space<vmem>>, vector<96x256xf32>
    %c0_4 = arith.constant 0 : index
    %c0_5 = arith.constant 0 : index
    %5 = vector.load %arg4[%c0_4, %c0_5] : memref<256x256xf32, #tpu.memory_space<vmem>>, vector<256x256xf32>
    %cst = arith.constant dense<0.000000e+00> : vector<96x256xf32>
    %6 = tpu.matmul %4, %5, %cst {dimension_numbers = #tpu.dot_dimension_numbers<[1], [0], [0], [1], [0, 0, 1, 1], [], []>} : vector<96x256xf32>, vector<256x256xf32>, vector<96x256xf32> -> vector<96x256xf32>
    %7 = arith.addf %3, %6 : vector<96x256xf32>
    %c0_6 = arith.constant 0 : index
    %c0_7 = arith.constant 0 : index
    %8 = vector.load %arg9[%c0_6, %c0_7] : memref<96x256xf32, #tpu.memory_space<vmem>>, vector<96x256xf32>
    tpu.vector_store %arg9[%c0_6, %c0_7], %7 {strides = array<i32>} : memref<96x256xf32, #tpu.memory_space<vmem>>, vector<96x256xf32>,
    %c0_i32_8 = arith.constant 0 : i32
    %9 = arith.cmpi eq, %arg2, %c0_i32_8 : i32
    %10 = arith.extui %9 : i1 to i32
    %c0_i32_9 = arith.constant 0 : i32
    %11 = arith.cmpi ne, %10, %c0_i32_9 : i32
    scf.if %11 {
      %c0_10 = arith.constant 0 : index
      %c0_11 = arith.constant 0 : index
      %12 = vector.load %arg9[%c0_10, %c0_11] : memref<96x256xf32, #tpu.memory_space<vmem>>, vector<96x256xf32>
      %c0_12 = arith.constant 0 : index
      %c0_13 = arith.constant 0 : index
      %13 = vector.load %arg5[%c0_12, %c0_13] : memref<1x256xf32, #tpu.memory_space<vmem>>, vector<1x256xf32>
      %14 = vector.broadcast %13 : vector<1x256xf32> to vector<96x256xf32>
      %15 = arith.mulf %12, %14 : vector<96x256xf32>
      %c0_14 = arith.constant 0 : index
      %c0_15 = arith.constant 0 : index
      %16 = vector.load %arg6[%c0_14, %c0_15] : memref<1x256xf32, #tpu.memory_space<vmem>>, vector<1x256xf32>
      %17 = vector.broadcast %16 : vector<1x256xf32> to vector<96x256xf32>
      %18 = arith.addf %15, %17 : vector<96x256xf32>
      %c0_16 = arith.constant 0 : index
      %c0_17 = arith.constant 0 : index
      %19 = vector.load %arg7[%c0_16, %c0_17] : memref<96x256xf32, #tpu.memory_space<vmem>>, vector<96x256xf32>
      %20 = arith.addf %18, %19 : vector<96x256xf32>
      %cst_18 = arith.constant 0.000000e+00 : f32
      %21 = vector.broadcast %cst_18 : f32 to vector<96x256xf32>
      %22 = arith.maximumf %20, %21 : vector<96x256xf32>
      %c0_19 = arith.constant 0 : index
      %c0_20 = arith.constant 0 : index
      %23 = vector.load %arg8[%c0_19, %c0_20] : memref<96x256xf32, #tpu.memory_space<vmem>>, vector<96x256xf32>
      tpu.vector_store %arg8[%c0_19, %c0_20], %22 {strides = array<i32>} : memref<96x256xf32, #tpu.memory_space<vmem>>, vector<96x256xf32>,
    } else {
    }
    return
  }
  func.func @transform_0(%arg0: i32, %arg1: i32, %arg2: i32) -> (i32, i32) {
    %c0_i32 = arith.constant 0 : i32
    return %arg0, %arg2 : i32, i32
  }
  func.func @transform_1(%arg0: i32, %arg1: i32, %arg2: i32) -> (i32, i32) {
    %c0_i32 = arith.constant 0 : i32
    return %arg2, %arg1 : i32, i32
  }
  func.func @transform_2(%arg0: i32, %arg1: i32, %arg2: i32) -> (i32, i32) {
    %c0_i32 = arith.constant 0 : i32
    %c0_i32_0 = arith.constant 0 : i32
    return %c0_i32, %arg1 : i32, i32
  }
  func.func @transform_3(%arg0: i32, %arg1: i32, %arg2: i32) -> (i32, i32) {
    %c0_i32 = arith.constant 0 : i32
    %c0_i32_0 = arith.constant 0 : i32
    return %c0_i32, %arg1 : i32, i32
  }
  func.func @transform_4(%arg0: i32, %arg1: i32, %arg2: i32) -> (i32, i32) {
    %c0_i32 = arith.constant 0 : i32
    return %arg0, %arg1 : i32, i32
  }
  func.func @transform_5(%arg0: i32, %arg1: i32, %arg2: i32) -> (i32, i32) {
    %c0_i32 = arith.constant 0 : i32
    return %arg0, %arg1 : i32, i32
  }
}

</mosaic_0001>

<bundles_post_ra>
// kernel: tpu_custom_call.1
= control target key start
LH: loop header
LB: loop body
LE: loop exit
PB: predicated region body
PF: predicated region fallthrough
CT: control target
= control target key end

     0   :  { %10 = vsyncpa [#allocation4], 0  ;;  %s961_s0 = inlined_call_operand.hbm [shape: f32[96,256], index: 0, kind: input, shape index: {}]   ;;  %s962_s1 = inlined_call_operand.hbm [shape: f32[256,256], index: 1, kind: input, shape index: {}]   ;;  %s963_s2 = inlined_call_operand.vmem [shape: f32[1,256], index: 2, kind: input, shape index: {}]   ;;  %s964_s3 = inlined_call_operand.vmem [shape: f32[1,256], index: 3, kind: input, shape index: {}]   ;;  %s965_s4 = inlined_call_operand.hbm [shape: f32[96,256], index: 4, kind: input, shape index: {}]   ;;  %s966_s5 = inlined_call_operand.hbm [shape: f32[96,256], index: 5, kind: output, shape index: {}]  }
   0x1   :  { %11 = vsyncpa [#allocation7], 0 }
   0x2   :  { %12 = vsyncpa [#allocation5], 0  ;;  %s796_s18 = smov [#allocation6]   ;;  %s797_s20 = smov [#allocation3]  }
   0x3   :  { %s30_s19 = sshll.u32 %s796_s18, 4  ;;  %s18_s21 = sshll.u32 %s797_s20, 4  ;;  %s31_s19 = int_to_ptr.vmem [resolvable:$true] %s30_s19  ;;  %s832_s21 = int_to_ptr.vmem [resolvable:$true] %s18_s21 }
   0x4   :  { %s702_s24 = scalar_lea.hbm %s962_s1, 8192 }
   0x5   :  { %p703_p0 = scmp.ne.s32.totalorder %s962_s1, %s702_s24  ;;  %p706_p1 = scmp.lt.u32.totalorder %s702_s24, %s962_s1 }
   0x7   :  { %p708_p2 = pnand %p706_p1, %p703_p0 }
   0x9   :  { %711 = shalt.err (!%p708_p2)
}
   0xa   :  { %s712_s29 = scalar_lea.vmem %s31_s19, 8192  ;;  %p717_p4 = scmp.lt.s32.totalorder %s31_s19, %s31_s19 }
   0xb   :  { %p713_p3 = scmp.ne.s32.totalorder %s31_s19, %s712_s29  ;;  %p718_p5 = scmp.lt.s32.totalorder %s712_s29, %s712_s29 }
   0xd   :  { %p719_p6 = por %p718_p5, %p717_p4 }
   0xf   :  { %p720_p7 = pnand %p719_p6, %p713_p3 }
  0x11   :  { %723 = shalt.err (!%p720_p7)
}
  0x12   :  { %s798_s30 = smov 256   ;;  %s799_s6 = smov 16  }
  0x13   :  { %36 = dma.hbm_to_vmem [thread:$0]  %s962_s1, 8192, %s31_s19, [#allocation7], %s798_s30, %s798_s30, %s799_s6  }
  0x14   :  { %s724_s11 = scalar_lea.hbm %s961_s0, 3072 }
  0x15   :  { %p725_p8 = scmp.ne.s32.totalorder %s961_s0, %s724_s11  ;;  %p728_p9 = scmp.lt.u32.totalorder %s724_s11, %s961_s0 }
  0x17   :  { %p730_p10 = pnand %p728_p9, %p725_p8 }
  0x19   :  { %733 = shalt.err (!%p730_p10)
}
  0x1a   :  { %s734_s16 = scalar_lea.vmem %s832_s21, 3072  ;;  %p739_p12 = scmp.lt.s32.totalorder %s832_s21, %s832_s21 }
  0x1b   :  { %p735_p11 = scmp.ne.s32.totalorder %s832_s21, %s734_s16  ;;  %p740_p13 = scmp.lt.s32.totalorder %s734_s16, %s734_s16 }
  0x1d   :  { %p741_p0 = por %p740_p13, %p739_p12 }
  0x1f   :  { %p742_p1 = pnand %p741_p0, %p735_p11 }
  0x21   :  { %745 = shalt.err (!%p742_p1)
}
  0x22   :  { %24 = dma.hbm_to_vmem [thread:$0]  %s961_s0, 3072, %s832_s21, [#allocation4], %s798_s30, %s798_s30, %s799_s6  }
  0x23   :  { %s800_s18 = smov [#allocation8]   ;;  %s746_s23 = scalar_lea.hbm %s965_s4, 3072 }
  0x24   :  { %s46_s19 = sshll.u32 %s800_s18, 4  ;;  %p747_p2 = scmp.ne.s32.totalorder %s965_s4, %s746_s23  ;;  %s47_s19 = int_to_ptr.vmem [resolvable:$true] %s46_s19 }
  0x25   :  { %p750_p3 = scmp.lt.u32.totalorder %s746_s23, %s965_s4 }
  0x27   :  { %p752_p4 = pnand %p750_p3, %p747_p2 }
  0x29   :  { %755 = shalt.err (!%p752_p4)
}
  0x2a   :  { %s756_s28 = scalar_lea.vmem %s47_s19, 3072  ;;  %p761_p6 = scmp.lt.s32.totalorder %s47_s19, %s47_s19 }
  0x2b   :  { %p757_p5 = scmp.ne.s32.totalorder %s47_s19, %s756_s28  ;;  %p762_p7 = scmp.lt.s32.totalorder %s756_s28, %s756_s28 }
  0x2d   :  { %p763_p8 = por %p762_p7, %p761_p6 }
  0x2f   :  { %p764_p9 = pnand %p763_p8, %p757_p5 }
  0x31   :  { %767 = shalt.err (!%p764_p9)
}
  0x32   :  { %52 = dma.hbm_to_vmem [thread:$0]  %s965_s4, 3072, %s47_s19, [#allocation7], %s798_s30, %s798_s30, %s799_s6  }
  0x33   :  { %790 = dma.done.wait [#allocation4], 3072  }
  0x34   :  { %791 = vsyncadd [#allocation4], 4294964224 }
  0x35   :  { %792 = dma.done.wait [#allocation7], 11264  }
  0x36   :  { %793 = vsyncadd [#allocation7], 4294956032  ;;  %v139_v0 = vld [vmem:[#allocation6 + $0x8] sm:$0xff]  ;;  %v141_v1 = vld [vmem:[#allocation6 + $0x18] sm:$0xff] }
  0x37   :  { %v138_v2 = vld [vmem:[#allocation6] sm:$0xff]  ;;  %v600_v3 = vpack.c.bf16 %v141_v1, %v139_v0  ;;  %v140_v4 = vld [vmem:[#allocation6 + $0x10] sm:$0xff]  ;;  %v143_v5 = vld [vmem:[#allocation6 + $0x28] sm:$0xff] }
  0x38   :  { %v145_v6 = vld [vmem:[#allocation6 + $0x38] sm:$0xff]  ;;  %v602_v7 = vpack.c.bf16 %v140_v4, %v138_v2  ;;  %v142_v9 = vld [vmem:[#allocation6 + $0x20] sm:$0xff]  ;;  %v144_v10 = vld [vmem:[#allocation6 + $0x30] sm:$0xff] }
  0x39   :  { %v604_v8 = vpack.c.bf16 %v145_v6, %v143_v5  ;;  %v147_v11 = vld [vmem:[#allocation6 + $0x48] sm:$0xff]  ;;  %601 = vmatprep.subr.bf16.mxu0 %v600_v3  ;;  %664 = vmatprep.subr.bf16.mxu1 %v600_v3  ;;  %v149_v12 = vld [vmem:[#allocation6 + $0x58] sm:$0xff]  ;;  %v606_v13 = vpack.c.bf16 %v144_v10, %v142_v9  ;;  %v146_v15 = vld [vmem:[#allocation6 + $0x40] sm:$0xff] }
  0x3a   :  { %603 = vmatpush1.bf16.msra.mxu0 %v602_v7  ;;  %680 = vmatpush1.bf16.msra.mxu1 %v602_v7  ;;  %v608_v14 = vpack.c.bf16 %v149_v12, %v147_v11  ;;  %v148_v16 = vld [vmem:[#allocation6 + $0x50] sm:$0xff]  ;;  %v151_v17 = vld [vmem:[#allocation6 + $0x68] sm:$0xff]  ;;  %v153_v18 = vld [vmem:[#allocation6 + $0x78] sm:$0xff] }
  0x3b   :  { %605 = vmatprep.subr.bf16.mxu0 %v604_v8  ;;  %665 = vmatprep.subr.bf16.mxu1 %v604_v8  ;;  %v610_v19 = vpack.c.bf16 %v148_v16, %v146_v15  ;;  %v612_v20 = vpack.c.bf16 %v153_v18, %v151_v17  ;;  %v150_v21 = vld [vmem:[#allocation6 + $0x60] sm:$0xff]  ;;  %v152_v22 = vld [vmem:[#allocation6 + $0x70] sm:$0xff]  ;;  %v155_v23 = vld [vmem:[#allocation6 + $0x88] sm:$0xff] }
  0x3c   :  { %v157_v24 = vld [vmem:[#allocation6 + $0x98] sm:$0xff]  ;;  %v614_v25 = vpack.c.bf16 %v152_v22, %v150_v21  ;;  %v154_v27 = vld [vmem:[#allocation6 + $0x80] sm:$0xff]  ;;  %v156_v28 = vld [vmem:[#allocation6 + $0x90] sm:$0xff] }
  0x3d   :  { %v616_v26 = vpack.c.bf16 %v157_v24, %v155_v23  ;;  %v159_v29 = vld [vmem:[#allocation6 + $0xa8] sm:$0xff]  ;;  %v161_v30 = vld [vmem:[#allocation6 + $0xb8] sm:$0xff]  ;;  %v618_v31 = vpack.c.bf16 %v156_v28, %v154_v27  ;;  %v158_v33 = vld [vmem:[#allocation6 + $0xa0] sm:$0xff] }
  0x3e   :  { %607 = vmatpush1.bf16.msra.mxu0 %v606_v13  ;;  %681 = vmatpush1.bf16.msra.mxu1 %v606_v13  ;;  %v620_v32 = vpack.c.bf16 %v161_v30, %v159_v29  ;;  %v160_v34 = vld [vmem:[#allocation6 + $0xb0] sm:$0xff]  ;;  %v163_v35 = vld [vmem:[#allocation6 + $0xc8] sm:$0xff]  ;;  %v165_v36 = vld [vmem:[#allocation6 + $0xd8] sm:$0xff] }
  0x3f   :  { %609 = vmatprep.subr.bf16.mxu0 %v608_v14  ;;  %666 = vmatprep.subr.bf16.mxu1 %v608_v14  ;;  %v622_v37 = vpack.c.bf16 %v160_v34, %v158_v33  ;;  %v162_v38 = vld [vmem:[#allocation6 + $0xc0] sm:$0xff]  ;;  %v624_v39 = vpack.c.bf16 %v165_v36, %v163_v35  ;;  %v164_v40 = vld [vmem:[#allocation6 + $0xd0] sm:$0xff]  ;;  %v115_v41 = vld [vmem:[#allocation3 + $0x8] sm:$0xff] }
  0x40   :  { %v127_v42 = vld [vmem:[#allocation3 + $0x68] sm:$0xff]  ;;  %v169_v44 = vld [vmem:[#allocation6 + $0xf8] sm:$0xff]  ;;  %266 = vmatprep.mubr.f32.mxu0 %v115_v41  ;;  %v626_v45 = vpack.c.bf16 %v164_v40, %v162_v38  ;;  %v166_v47 = vld [vmem:[#allocation6 + $0xe0] sm:$0xff] }
  0x41   :  { %v167_v43 = vld [vmem:[#allocation6 + $0xe8] sm:$0xff]  ;;  %302 = vmatprep.mubr.f32.mxu1 %v127_v42  ;;  %v168_v48 = vld [vmem:[#allocation6 + $0xf0] sm:$0xff]  ;;  %v173_v50 = vld [vmem:[#allocation6 + $0x118] sm:$0xff] }
  0x42   :  { %611 = vmatpush1.bf16.msra.mxu0 %v610_v19  ;;  %682 = vmatpush1.bf16.msra.mxu1 %v610_v19  ;;  %v628_v46 = vpack.c.bf16 %v169_v44, %v167_v43  ;;  %v171_v49 = vld [vmem:[#allocation6 + $0x108] sm:$0xff]  ;;  %v630_v51 = vpack.c.bf16 %v168_v48, %v166_v47  ;;  %v170_v53 = vld [vmem:[#allocation6 + $0x100] sm:$0xff]  ;;  %v172_v54 = vld [vmem:[#allocation6 + $0x110] sm:$0xff] }
  0x43   :  { %613 = vmatprep.subr.bf16.mxu0 %v612_v20  ;;  %667 = vmatprep.subr.bf16.mxu1 %v612_v20  ;;  %v632_v52 = vpack.c.bf16 %v173_v50, %v171_v49  ;;  %v175_v55 = vld [vmem:[#allocation6 + $0x128] sm:$0xff]  ;;  %v177_v56 = vld [vmem:[#allocation6 + $0x138] sm:$0xff]  ;;  %v634_v57 = vpack.c.bf16 %v172_v54, %v170_v53  ;;  %v174_v59 = vld [vmem:[#allocation6 + $0x120] sm:$0xff] }
  0x44   :  { %v636_v58 = vpack.c.bf16 %v177_v56, %v175_v55  ;;  %v176_v60 = vld [vmem:[#allocation6 + $0x130] sm:$0xff]  ;;  %v179_v61 = vld [vmem:[#allocation6 + $0x148] sm:$0xff]  ;;  %v181_v62 = vld [vmem:[#allocation6 + $0x158] sm:$0xff]  ;;  %v416_v56 = vlaneseq }
  0x45   :  { %v638_v63 = vpack.c.bf16 %v176_v60, %v174_v59  ;;  %v640_v0 = vpack.c.bf16 %v181_v62, %v179_v61  ;;  %v178_v1 = vld [vmem:[#allocation6 + $0x140] sm:$0xff]  ;;  %v180_v2 = vld [vmem:[#allocation6 + $0x150] sm:$0xff]  ;;  %v183_v3 = vld [vmem:[#allocation6 + $0x168] sm:$0xff] }
  0x46   :  { %615 = vmatpush1.bf16.msra.mxu0 %v614_v25  ;;  %683 = vmatpush1.bf16.msra.mxu1 %v614_v25  ;;  %v185_v4 = vld [vmem:[#allocation6 + $0x178] sm:$0xff]  ;;  %v642_v5 = vpack.c.bf16 %v180_v2, %v178_v1  ;;  %v182_v7 = vld [vmem:[#allocation6 + $0x160] sm:$0xff]  ;;  %v184_v8 = vld [vmem:[#allocation6 + $0x170] sm:$0xff] }
  0x47   :  { %617 = vmatprep.subr.bf16.mxu0 %v616_v26  ;;  %668 = vmatprep.subr.bf16.mxu1 %v616_v26  ;;  %v644_v6 = vpack.c.bf16 %v185_v4, %v183_v3  ;;  %v187_v9 = vld [vmem:[#allocation6 + $0x188] sm:$0xff]  ;;  %v189_v10 = vld [vmem:[#allocation6 + $0x198] sm:$0xff]  ;;  %v646_v11 = vpack.c.bf16 %v184_v8, %v182_v7  ;;  %v186_v13 = vld [vmem:[#allocation6 + $0x180] sm:$0xff] }
  0x48   :  { %v648_v12 = vpack.c.bf16 %v189_v10, %v187_v9  ;;  %v188_v14 = vld [vmem:[#allocation6 + $0x190] sm:$0xff]  ;;  %v191_v15 = vld [vmem:[#allocation6 + $0x1a8] sm:$0xff]  ;;  %v193_v16 = vld [vmem:[#allocation6 + $0x1b8] sm:$0xff] }
  0x49   :  { %v650_v17 = vpack.c.bf16 %v188_v14, %v186_v13  ;;  %v652_v18 = vpack.c.bf16 %v193_v16, %v191_v15  ;;  %v190_v19 = vld [vmem:[#allocation6 + $0x1a0] sm:$0xff]  ;;  %v192_v20 = vld [vmem:[#allocation6 + $0x1b0] sm:$0xff]  ;;  %v195_v21 = vld [vmem:[#allocation6 + $0x1c8] sm:$0xff] }
  0x4a   :  { %619 = vmatpush1.bf16.msra.mxu0 %v618_v31  ;;  %684 = vmatpush1.bf16.msra.mxu1 %v618_v31  ;;  %v197_v22 = vld [vmem:[#allocation6 + $0x1d8] sm:$0xff]  ;;  %v654_v23 = vpack.c.bf16 %v192_v20, %v190_v19  ;;  %v194_v25 = vld [vmem:[#allocation6 + $0x1c0] sm:$0xff]  ;;  %v196_v26 = vld [vmem:[#allocation6 + $0x1d0] sm:$0xff] }
  0x4b   :  { %621 = vmatprep.subr.bf16.mxu0 %v620_v32  ;;  %669 = vmatprep.subr.bf16.mxu1 %v620_v32  ;;  %v656_v24 = vpack.c.bf16 %v197_v22, %v195_v21  ;;  %v199_v27 = vld [vmem:[#allocation6 + $0x1e8] sm:$0xff]  ;;  %v201_v28 = vld [vmem:[#allocation6 + $0x1f8] sm:$0xff]  ;;  %v658_v29 = vpack.c.bf16 %v196_v26, %v194_v25  ;;  %v198_v31 = vld [vmem:[#allocation6 + $0x1e0] sm:$0xff] }
  0x4c   :  { %v660_v30 = vpack.c.bf16 %v201_v28, %v199_v27  ;;  %v200_v32 = vld [vmem:[#allocation6 + $0x1f0] sm:$0xff]  ;;  %v114_v34 = vld [vmem:[#allocation3] sm:$0xff]  ;;  %v117_v36 = vld [vmem:[#allocation3 + $0x18] sm:$0xff] }
  0x4d   :  { %v662_v33 = vpack.c.bf16 %v200_v32, %v198_v31  ;;  %v126_v35 = vld [vmem:[#allocation3 + $0x60] sm:$0xff]  ;;  %v116_v38 = vld [vmem:[#allocation3 + $0x10] sm:$0xff]  ;;  %v119_v40 = vld [vmem:[#allocation3 + $0x28] sm:$0xff] }
  0x4e   :  { %623 = vmatpush1.bf16.msra.mxu0 %v622_v37  ;;  %685 = vmatpush1.bf16.msra.mxu1 %v622_v37  ;;  %v129_v37 = vld [vmem:[#allocation3 + $0x78] sm:$0xff]  ;;  %v131_v41 = vld [vmem:[#allocation3 + $0x88] sm:$0xff]  ;;  %v118_v42 = vld [vmem:[#allocation3 + $0x20] sm:$0xff] }
  0x4f   :  { %625 = vmatprep.subr.bf16.mxu0 %v624_v39  ;;  %670 = vmatprep.subr.bf16.mxu1 %v624_v39  ;;  %v128_v39 = vld [vmem:[#allocation3 + $0x70] sm:$0xff]  ;;  %v130_v43 = vld [vmem:[#allocation3 + $0x80] sm:$0xff]  ;;  %v121_v44 = vld [vmem:[#allocation3 + $0x38] sm:$0xff] }
  0x50   :  { %v132_v47 = vld [vmem:[#allocation3 + $0x90] sm:$0xff]  ;;  %v123_v48 = vld [vmem:[#allocation3 + $0x48] sm:$0xff]  ;;  %v122_v50 = vld [vmem:[#allocation3 + $0x40] sm:$0xff] }
  0x51   :  { %v135_v49 = vld [vmem:[#allocation3 + $0xa8] sm:$0xff]  ;;  %v137_v53 = vld [vmem:[#allocation3 + $0xb8] sm:$0xff]  ;;  %v124_v54 = vld [vmem:[#allocation3 + $0x50] sm:$0xff] }
  0x52   :  { %627 = vmatpush1.bf16.msra.mxu0 %v626_v45  ;;  %686 = vmatpush1.bf16.msra.mxu1 %v626_v45  ;;  %v133_v45 = vld [vmem:[#allocation3 + $0x98] sm:$0xff]  ;;  %v136_v55 = vld [vmem:[#allocation3 + $0xb0] sm:$0xff]  ;;  %v414_v59 = vld [vmem:[%s963_s2] sm:$0x3]  ;;  %s801_s2 = smov [#allocation9]  }
  0x53   :  { %629 = vmatprep.subr.bf16.mxu0 %v628_v46  ;;  %671 = vmatprep.subr.bf16.mxu1 %v628_v46  ;;  %v120_v46 = vld [vmem:[#allocation3 + $0x30] sm:$0xff]  ;;  %v450_v61 = vld [vmem:[%s964_s3] sm:$0x3]  ;;  %v487_v14 = vld [vmem:[#allocation8 + $0x8] sm:$0xff]  ;;  %s587_s3 = sshll.u32 %s801_s2, 4  ;;  %s588_s3 = int_to_ptr.vmem [resolvable:$true] %s587_s3 }
  0x54   :  { %v486_v8 = vld [vmem:[#allocation8] sm:$0xff]  ;;  %v499_v15 = vld [vmem:[#allocation8 + $0x68] sm:$0xff]  ;;  %v488_v28 = vld [vmem:[#allocation8 + $0x10] sm:$0xff]  ;;  %s768_s9 = scalar_lea.vmem %s588_s3, 3072  ;;  %p773_p11 = scmp.lt.s32.totalorder %s588_s3, %s588_s3 }
  0x55   :  { %v498_v9 = vld [vmem:[#allocation8 + $0x60] sm:$0xff]  ;;  %p769_p10 = scmp.ne.s32.totalorder %s588_s3, %s768_s9  ;;  %p774_p12 = scmp.lt.s32.totalorder %s768_s9, %s768_s9 }
  0x56   :  { %631 = vmatpush1.bf16.msra.mxu0 %v630_v51  ;;  %687 = vmatpush1.bf16.msra.mxu1 %v630_v51  ;;  %v134_v51 = vld [vmem:[#allocation3 + $0xa0] sm:$0xff] }
  0x57   :  { %633 = vmatprep.subr.bf16.mxu0 %v632_v52  ;;  %672 = vmatprep.subr.bf16.mxu1 %v632_v52  ;;  %v125_v52 = vld [vmem:[#allocation3 + $0x58] sm:$0xff]  ;;  %p775_p13 = por %p774_p12, %p773_p11 }
  0x59   :  { %p776_p0 = pnand %p775_p13, %p769_p10 }
  0x5a   :  { %635 = vmatpush1.bf16.msra.mxu0 %v634_v57  ;;  %688 = vmatpush1.bf16.msra.mxu1 %v634_v57  ;;  %v417_v57 = vshrl.u32 %v416_v56, 7 }
  0x5b   :  { %637 = vmatprep.subr.bf16.mxu0 %v636_v58  ;;  %673 = vmatprep.subr.bf16.mxu1 %v636_v58 }
  0x5c   :  { %v418_v58 = vsub.s32 0, %v417_v57  ;;  %v422_v60 = vsub.s32 1, %v417_v57 }
  0x5e   :  { %639 = vmatpush1.bf16.msra.mxu0 %v638_v63  ;;  %689 = vmatpush1.bf16.msra.mxu1 %v638_v63  ;;  %v890_v62 = vrot.slane %v414_v59, %v418_v58  ;;  %v892_v63 = vrot.slane %v414_v59, %v422_v60  ;;  %v896_v3 = vrot.slane %v450_v61, %v422_v60  ;;  %v491_v60 = vld [vmem:[#allocation8 + $0x28] sm:$0xff] }
  0x5f   :  { %641 = vmatprep.subr.bf16.mxu0 %v640_v0  ;;  %674 = vmatprep.subr.bf16.mxu1 %v640_v0  ;;  %v894_v0 = vrot.slane %v450_v61, %v418_v58  ;;  %v503_v61 = vld [vmem:[#allocation8 + $0x88] sm:$0xff] }
  0x62   :  { %643 = vmatpush1.bf16.msra.mxu0 %v642_v5  ;;  %690 = vmatpush1.bf16.msra.mxu1 %v642_v5 }
  0x63   :  { %645 = vmatprep.subr.bf16.mxu0 %v644_v6  ;;  %675 = vmatprep.subr.bf16.mxu1 %v644_v6 }
  0x66   :  { %647 = vmatpush1.bf16.msra.mxu0 %v646_v11  ;;  %691 = vmatpush1.bf16.msra.mxu1 %v646_v11 }
  0x67   :  { %649 = vmatprep.subr.bf16.mxu0 %v648_v12  ;;  %676 = vmatprep.subr.bf16.mxu1 %v648_v12 }
  0x6a   :  { %651 = vmatpush1.bf16.msra.mxu0 %v650_v17  ;;  %692 = vmatpush1.bf16.msra.mxu1 %v650_v17 }
  0x6b   :  { %653 = vmatprep.subr.bf16.mxu0 %v652_v18  ;;  %677 = vmatprep.subr.bf16.mxu1 %v652_v18 }
  0x6e   :  { %655 = vmatpush1.bf16.msra.mxu0 %v654_v23  ;;  %693 = vmatpush1.bf16.msra.mxu1 %v654_v23 }
  0x6f   :  { %657 = vmatprep.subr.bf16.mxu0 %v656_v24  ;;  %678 = vmatprep.subr.bf16.mxu1 %v656_v24 }
  0x72   :  { %659 = vmatpush1.bf16.msra.mxu0 %v658_v29  ;;  %694 = vmatpush1.bf16.msra.mxu1 %v658_v29  ;;  %v500_v29 = vld [vmem:[#allocation8 + $0x70] sm:$0xff] }
  0x73   :  { %661 = vmatprep.subr.bf16.mxu0 %v660_v30  ;;  %679 = vmatprep.subr.bf16.mxu1 %v660_v30 }
  0x76   :  { %663 = vmatpush1.bf16.msra.mxu0 %v662_v33  ;;  %695 = vmatpush1.bf16.msra.mxu1 %v662_v33 }
  0x79   :  { %267 = vmatmul.mubr.f32.vlgmr.msra.gmra.mrb[0].mxu0 %v114_v34  ;;  %303 = vmatmul.mubr.f32.vlgmr.msra.gmra.mrb[0].mxu1 %v126_v35 }
  0x7a   :  { %272 = vmatprep.mubr.f32.mxu0 %v117_v36  ;;  %308 = vmatprep.mubr.f32.mxu1 %v129_v37  ;;  %v489_v36 = vld [vmem:[#allocation8 + $0x18] sm:$0xff] }
  0x7b   :  { %v501_v37 = vld [vmem:[#allocation8 + $0x78] sm:$0xff] }
  0x7d   :  { %273 = vmatmul.mubr.f32.gmra.mrb[2].mxu0 %v116_v38  ;;  %309 = vmatmul.mubr.f32.gmra.mrb[2].mxu1 %v128_v39 }
  0x7e   :  { %278 = vmatprep.mubr.f32.mxu0 %v119_v40  ;;  %314 = vmatprep.mubr.f32.mxu1 %v131_v41 }
  0x81   :  { %279 = vmatmul.mubr.f32.gmra.mrb[4].mxu0 %v118_v42  ;;  %315 = vmatmul.mubr.f32.gmra.mrb[4].mxu1 %v130_v43 }
  0x82   :  { %284 = vmatprep.mubr.f32.mxu0 %v121_v44  ;;  %320 = vmatprep.mubr.f32.mxu1 %v133_v45 }
  0x85   :  { %285 = vmatmul.mubr.f32.gmra.mrb[6].mxu0 %v120_v46  ;;  %321 = vmatmul.mubr.f32.gmra.mrb[6].mxu1 %v132_v47 }
  0x86   :  { %290 = vmatprep.mubr.f32.mxu0 %v123_v48  ;;  %326 = vmatprep.mubr.f32.mxu1 %v135_v49 }
  0x89   :  { %291 = vmatmul.mubr.f32.gmra.mrb[8].mxu0 %v122_v50  ;;  %327 = vmatmul.mubr.f32.gmra.mrb[8].mxu1 %v134_v51 }
  0x8a   :  { %296 = vmatprep.mubr.f32.mxu0 %v125_v52  ;;  %332 = vmatprep.mubr.f32.mxu1 %v137_v53  ;;  %v490_v52 = vld [vmem:[#allocation8 + $0x20] sm:$0xff] }
  0x8b   :  { %v502_v53 = vld [vmem:[#allocation8 + $0x80] sm:$0xff] }
  0x8d   :  { %297 = vmatmul.mubr.f32.gmra.mrb[10].mxu0 %v124_v54  ;;  %333 = vmatmul.mubr.f32.gmra.mrb[10].mxu1 %v136_v55 }
 0x14c   :  { %v268_v1 = vpop.f32.mrb[0].mxu0  ;;  %v304_v2 = vpop.f32.mrb[0].mxu1 }
 0x14d   :  { %v426_v4 = vmul.f32 %v890_v62, %v268_v1  ;;  %v438_v5 = vmul.f32 %v890_v62, %v304_v2  ;;  %v270_v6 = vpop.f32.mrb[1].mxu0  ;;  %v306_v7 = vpop.f32.mrb[1].mxu1 }
 0x14e   :  { %v427_v10 = vmul.f32 %v892_v63, %v270_v6  ;;  %v439_v11 = vmul.f32 %v892_v63, %v306_v7 }
 0x14f   :  { %v462_v12 = vadd.f32 %v894_v0, %v426_v4  ;;  %v474_v13 = vadd.f32 %v894_v0, %v438_v5 }
 0x150   :  { %v463_v16 = vadd.f32 %v896_v3, %v427_v10  ;;  %v475_v17 = vadd.f32 %v896_v3, %v439_v11  ;;  %v274_v18 = vpop.f32.mrb[2].mxu0  ;;  %v310_v19 = vpop.f32.mrb[2].mxu1 }
 0x151   :  { %v510_v20 = vadd.f32 %v486_v8, %v462_v12  ;;  %v522_v21 = vadd.f32 %v498_v9, %v474_v13  ;;  %v428_v22 = vmul.f32 %v890_v62, %v274_v18  ;;  %v440_v23 = vmul.f32 %v890_v62, %v310_v19  ;;  %v276_v24 = vpop.f32.mrb[3].mxu0  ;;  %v312_v25 = vpop.f32.mrb[3].mxu1 }
 0x152   :  { %v511_v26 = vadd.f32 %v487_v14, %v463_v16  ;;  %v523_v27 = vadd.f32 %v499_v15, %v475_v17  ;;  %v429_v30 = vmul.f32 %v892_v63, %v276_v24  ;;  %v441_v31 = vmul.f32 %v892_v63, %v312_v25  ;;  %v492_v16 = vld [vmem:[#allocation8 + $0x30] sm:$0xff]  ;;  %v493_v24 = vld [vmem:[#allocation8 + $0x38] sm:$0xff] }
 0x153   :  { %v534_v32 = vmax.f32 %v510_v20, 0.0  ;;  %v546_v33 = vmax.f32 %v522_v21, 0.0  ;;  %v464_v34 = vadd.f32 %v894_v0, %v428_v22  ;;  %v476_v35 = vadd.f32 %v894_v0, %v440_v23  ;;  %v504_v17 = vld [vmem:[#allocation8 + $0x90] sm:$0xff]  ;;  %v505_v25 = vld [vmem:[#allocation8 + $0x98] sm:$0xff] }
 0x154   :  { %v535_v38 = vmax.f32 %v511_v26, 0.0  ;;  %v547_v39 = vmax.f32 %v523_v27, 0.0  ;;  %v465_v40 = vadd.f32 %v896_v3, %v429_v30  ;;  %v477_v41 = vadd.f32 %v896_v3, %v441_v31  ;;  %v280_v42 = vpop.f32.mrb[4].mxu0  ;;  %v316_v43 = vpop.f32.mrb[4].mxu1 }
 0x155   :  { %558 = vst [vmem:[#allocation9] sm:$0xff] %v534_v32  ;;  %570 = vst [vmem:[#allocation9 + $0x60] sm:$0xff] %v546_v33  ;;  %v512_v44 = vadd.f32 %v488_v28, %v464_v34  ;;  %v524_v45 = vadd.f32 %v500_v29, %v476_v35  ;;  %v430_v46 = vmul.f32 %v890_v62, %v280_v42  ;;  %v282_v48 = vpop.f32.mrb[5].mxu0  ;;  %v318_v49 = vpop.f32.mrb[5].mxu1 }
 0x156   :  { %v442_v47 = vmul.f32 %v890_v62, %v316_v43  ;;  %559 = vst [vmem:[#allocation9 + $0x8] sm:$0xff] %v535_v38  ;;  %571 = vst [vmem:[#allocation9 + $0x68] sm:$0xff] %v547_v39  ;;  %v513_v50 = vadd.f32 %v489_v36, %v465_v40  ;;  %v525_v51 = vadd.f32 %v501_v37, %v477_v41  ;;  %v494_v40 = vld [vmem:[#allocation8 + $0x40] sm:$0xff] }
 0x157   :  { %v431_v54 = vmul.f32 %v892_v63, %v282_v48  ;;  %v443_v55 = vmul.f32 %v892_v63, %v318_v49  ;;  %v536_v56 = vmax.f32 %v512_v44, 0.0  ;;  %v548_v57 = vmax.f32 %v524_v45, 0.0  ;;  %v506_v41 = vld [vmem:[#allocation8 + $0xa0] sm:$0xff]  ;;  %v495_v48 = vld [vmem:[#allocation8 + $0x48] sm:$0xff] }
 0x158   :  { %v466_v58 = vadd.f32 %v894_v0, %v430_v46  ;;  %v478_v59 = vadd.f32 %v894_v0, %v442_v47  ;;  %v537_v1 = vmax.f32 %v513_v50, 0.0  ;;  %v549_v2 = vmax.f32 %v525_v51, 0.0  ;;  %v286_v6 = vpop.f32.mrb[6].mxu0  ;;  %v322_v7 = vpop.f32.mrb[6].mxu1  ;;  %v507_v49 = vld [vmem:[#allocation8 + $0xa8] sm:$0xff] }
 0x159   :  { %v467_v4 = vadd.f32 %v896_v3, %v431_v54  ;;  %v479_v5 = vadd.f32 %v896_v3, %v443_v55  ;;  %560 = vst [vmem:[#allocation9 + $0x10] sm:$0xff] %v536_v56  ;;  %572 = vst [vmem:[#allocation9 + $0x70] sm:$0xff] %v548_v57  ;;  %v432_v10 = vmul.f32 %v890_v62, %v286_v6  ;;  %v288_v12 = vpop.f32.mrb[7].mxu0  ;;  %v324_v13 = vpop.f32.mrb[7].mxu1 }
 0x15a   :  { %v514_v8 = vadd.f32 %v490_v52, %v466_v58  ;;  %v526_v9 = vadd.f32 %v502_v53, %v478_v59  ;;  %v444_v11 = vmul.f32 %v890_v62, %v322_v7  ;;  %561 = vst [vmem:[#allocation9 + $0x18] sm:$0xff] %v537_v1  ;;  %573 = vst [vmem:[#allocation9 + $0x78] sm:$0xff] %v549_v2 }
 0x15b   :  { %v515_v14 = vadd.f32 %v491_v60, %v467_v4  ;;  %v527_v15 = vadd.f32 %v503_v61, %v479_v5  ;;  %v433_v18 = vmul.f32 %v892_v63, %v288_v12  ;;  %v445_v19 = vmul.f32 %v892_v63, %v324_v13  ;;  %v496_v4 = vld [vmem:[#allocation8 + $0x50] sm:$0xff]  ;;  %v497_v12 = vld [vmem:[#allocation8 + $0x58] sm:$0xff] }
 0x15c   :  { %v538_v20 = vmax.f32 %v514_v8, 0.0  ;;  %v550_v21 = vmax.f32 %v526_v9, 0.0  ;;  %v468_v22 = vadd.f32 %v894_v0, %v432_v10  ;;  %v480_v23 = vadd.f32 %v894_v0, %v444_v11  ;;  %v292_v30 = vpop.f32.mrb[8].mxu0  ;;  %v328_v31 = vpop.f32.mrb[8].mxu1  ;;  %v508_v5 = vld [vmem:[#allocation8 + $0xb0] sm:$0xff] }
 0x15d   :  { %v539_v26 = vmax.f32 %v515_v14, 0.0  ;;  %v551_v27 = vmax.f32 %v527_v15, 0.0  ;;  %v469_v28 = vadd.f32 %v896_v3, %v433_v18  ;;  %v481_v29 = vadd.f32 %v896_v3, %v445_v19  ;;  %v294_v36 = vpop.f32.mrb[9].mxu0  ;;  %v330_v37 = vpop.f32.mrb[9].mxu1 }
 0x15e   :  { %562 = vst [vmem:[#allocation9 + $0x20] sm:$0xff] %v538_v20  ;;  %574 = vst [vmem:[#allocation9 + $0x80] sm:$0xff] %v550_v21  ;;  %v516_v32 = vadd.f32 %v492_v16, %v468_v22  ;;  %v528_v33 = vadd.f32 %v504_v17, %v480_v23  ;;  %v434_v34 = vmul.f32 %v890_v62, %v292_v30 }
 0x15f   :  { %v446_v35 = vmul.f32 %v890_v62, %v328_v31  ;;  %563 = vst [vmem:[#allocation9 + $0x28] sm:$0xff] %v539_v26  ;;  %575 = vst [vmem:[#allocation9 + $0x88] sm:$0xff] %v551_v27  ;;  %v517_v38 = vadd.f32 %v493_v24, %v469_v28  ;;  %v529_v39 = vadd.f32 %v505_v25, %v481_v29 }
 0x160   :  { %v435_v42 = vmul.f32 %v892_v63, %v294_v36  ;;  %v447_v43 = vmul.f32 %v892_v63, %v330_v37  ;;  %v540_v44 = vmax.f32 %v516_v32, 0.0  ;;  %v552_v45 = vmax.f32 %v528_v33, 0.0  ;;  %v298_v54 = vpop.f32.mrb[10].mxu0  ;;  %v334_v55 = vpop.f32.mrb[10].mxu1 }
 0x161   :  { %v470_v46 = vadd.f32 %v894_v0, %v434_v34  ;;  %v482_v47 = vadd.f32 %v894_v0, %v446_v35  ;;  %v541_v50 = vmax.f32 %v517_v38, 0.0  ;;  %v553_v51 = vmax.f32 %v529_v39, 0.0  ;;  %v300_v60 = vpop.f32.mrb[11].mxu0  ;;  %v336_v61 = vpop.f32.mrb[11].mxu1 }
 0x162   :  { %v471_v52 = vadd.f32 %v896_v3, %v435_v42  ;;  %v483_v53 = vadd.f32 %v896_v3, %v447_v43  ;;  %564 = vst [vmem:[#allocation9 + $0x30] sm:$0xff] %v540_v44  ;;  %576 = vst [vmem:[#allocation9 + $0x90] sm:$0xff] %v552_v45  ;;  %v436_v58 = vmul.f32 %v890_v62, %v298_v54 }
 0x163   :  { %v518_v56 = vadd.f32 %v494_v40, %v470_v46  ;;  %v530_v57 = vadd.f32 %v506_v41, %v482_v47  ;;  %v448_v59 = vmul.f32 %v890_v62, %v334_v55  ;;  %565 = vst [vmem:[#allocation9 + $0x38] sm:$0xff] %v541_v50  ;;  %577 = vst [vmem:[#allocation9 + $0x98] sm:$0xff] %v553_v51  ;;  %v509_v62 = vld [vmem:[#allocation8 + $0xb8] sm:$0xff] }
 0x164   :  { %v519_v1 = vadd.f32 %v495_v48, %v471_v52  ;;  %v531_v2 = vadd.f32 %v507_v49, %v483_v53  ;;  %v437_v6 = vmul.f32 %v892_v63, %v300_v60  ;;  %v449_v7 = vmul.f32 %v892_v63, %v336_v61 }
 0x165   :  { %v542_v8 = vmax.f32 %v518_v56, 0.0  ;;  %v554_v9 = vmax.f32 %v530_v57, 0.0  ;;  %v472_v10 = vadd.f32 %v894_v0, %v436_v58  ;;  %v484_v11 = vadd.f32 %v894_v0, %v448_v59 }
 0x166   :  { %v543_v13 = vmax.f32 %v519_v1, 0.0  ;;  %v555_v14 = vmax.f32 %v531_v2, 0.0  ;;  %v473_v15 = vadd.f32 %v896_v3, %v437_v6  ;;  %v485_v16 = vadd.f32 %v896_v3, %v449_v7 }
 0x167   :  { %566 = vst [vmem:[#allocation9 + $0x40] sm:$0xff] %v542_v8  ;;  %578 = vst [vmem:[#allocation9 + $0xa0] sm:$0xff] %v554_v9  ;;  %v520_v17 = vadd.f32 %v496_v4, %v472_v10  ;;  %v532_v18 = vadd.f32 %v508_v5, %v484_v11 }
 0x168   :  { %567 = vst [vmem:[#allocation9 + $0x48] sm:$0xff] %v543_v13  ;;  %579 = vst [vmem:[#allocation9 + $0xa8] sm:$0xff] %v555_v14  ;;  %v521_v63 = vadd.f32 %v497_v12, %v473_v15  ;;  %v533_v19 = vadd.f32 %v509_v62, %v485_v16 }
 0x169   :  { %v544_v20 = vmax.f32 %v520_v17, 0.0  ;;  %v556_v0 = vmax.f32 %v532_v18, 0.0 }
 0x16a   :  { %v545_v21 = vmax.f32 %v521_v63, 0.0  ;;  %v557_v22 = vmax.f32 %v533_v19, 0.0 }
 0x16b   :  { %568 = vst [vmem:[#allocation9 + $0x50] sm:$0xff] %v544_v20  ;;  %580 = vst [vmem:[#allocation9 + $0xb0] sm:$0xff] %v556_v0 }
 0x16c   :  { %569 = vst [vmem:[#allocation9 + $0x58] sm:$0xff] %v545_v21  ;;  %581 = vst [vmem:[#allocation9 + $0xb8] sm:$0xff] %v557_v22 }
 0x16d   :  { %779 = shalt.err (!%p776_p0)
}
 0x16e   :  { %s780_s12 = scalar_lea.hbm %s966_s5, 3072 }
 0x16f   :  { %p781_p1 = scmp.ne.s32.totalorder %s966_s5, %s780_s12  ;;  %p784_p2 = scmp.lt.u32.totalorder %s780_s12, %s966_s5 }
 0x171   :  { %p786_p3 = pnand %p784_p2, %p781_p1 }
 0x173   :  { %789 = shalt.err (!%p786_p3)
}
 0x174   :  { %593 = dma.vmem_to_hbm [thread:$0]  %s588_s3, 3072, %s966_s5, [#allocation5], %s798_s30, %s798_s30, %s799_s6  }
 0x175   :  { %794 = dma.done.wait [#allocation5], 3072  }
 0x176   :  { %795 = vsyncadd [#allocation5], 4294964224 }
 0x177   :  { %597 = vsyncpa [#allocation4], 1 }
 0x178   :  { %598 = vsyncpa [#allocation7], 1 }
 0x179   :  { %599 = vsyncpa [#allocation5], 1 }

</bundles_post_ra>
